<compile_context>
chip_gen: v6e
topology: v6e:2x2x1
jax: 0.10.0
libtpu: 0.0.40
codegen_flags: <defaults>
</compile_context>

<pallas_src>
import functools

import jax
import jax.numpy as jnp
from jax import lax
from jax.experimental import pallas as pl
from jax.experimental.pallas import tpu as pltpu

LANE = 128             # vreg lane width
_CHUNK_ROWS = 256      # inner-loop slice: 256 x 128 f32 = 32 vregs (bounded live range)
_MAX_BLOCK_ROWS = 4096 # 4096 x 128 f32 = 2 MiB per input block (double-buffered: 4 MiB)


def _round_up(a, b):
    return -(-a // b) * b


def _default_num_shards():
    """2 only on chips whose Pallas device has >1 TensorCore (v4/v5p megacore, v7x)."""
    try:
        kind = jax.devices()[0].device_kind.lower()
    except Exception:
        return 1
    # Single-TensorCore devices: 'parallel' axis of 2 would just be a serial
    # loop plus a possible wasted clamped duplicate block.
    if "v5 lite" in kind or "v5e" in kind or "v6 lite" in kind or "v6e" in kind:
        return 1
    if any(tag in kind for tag in ("v4", "v5p", "v7", "7x")):
        return 2
    return 1


def _reduce_kernel(shift_ref, x_ref, sum_ref, sq_ref, acc_s, acc_q, *,
                   chunk_rows, chunks_per_block, block_rows, rows_valid,
                   blocks_per_shard, num_full_blocks, needs_mask):
    """Accumulates per-lane sum / sum-of-squares of (x - shift) for one shard."""
    s = pl.program_id(0)          # shard (parallel axis)
    j = pl.program_id(1)          # block within shard (reduction axis, last)

    @pl.when(j == 0)
    def _():
        acc_s[...] = jnp.zeros_like(acc_s)
        acc_q[...] = jnp.zeros_like(acc_q)

    shift = shift_ref[0]
    groups = chunk_rows // 8
    zero = jnp.zeros((8, LANE), jnp.float32)

    def chunk_partials(ci, masked, row0):
        r0 = pl.multiple_of(ci * chunk_rows, chunk_rows)
        x = x_ref[pl.ds(r0, chunk_rows), :].astype(jnp.float32) - shift
        if masked:
            row_ids = row0 + r0 + lax.broadcasted_iota(
                jnp.int32, (chunk_rows, LANE), 0)
            x = jnp.where(row_ids < rows_valid, x, 0.0)
        xr = x.reshape(groups, 8, LANE)   # native (8,128) tile groups
        return jnp.sum(xr, axis=0), jnp.sum(xr * xr, axis=0)

    def accumulate(masked, row0=0):
        def body(ci, carry):
            cs, cq = carry
            ps, pq = chunk_partials(ci, masked, row0)
            return cs + ps, cq + pq
        cs, cq = lax.fori_loop(0, chunks_per_block, body, (zero, zero))
        # One small (8,128) RMW per *block*, not per vreg.
        acc_s[...] += cs
        acc_q[...] += cq

    if needs_mask:
        logical_block = s * blocks_per_shard + j
        is_edge = logical_block >= num_full_blocks

        @pl.when(is_edge)          # only the ragged / overshoot block pays for masking
        def _():
            accumulate(True, logical_block * block_rows)

        @pl.when(jnp.logical_not(is_edge))
        def _():
            accumulate(False)
    else:
        accumulate(False)

    @pl.when(j == pl.num_programs(1) - 1)
    def _():
        sum_ref[...] = jnp.sum(acc_s[...], axis=0, keepdims=True)
        sq_ref[...] = jnp.sum(acc_q[...], axis=0, keepdims=True)


def _partial_sums_pallas(x2d, center):
    """Returns (sum(x-center), sum((x-center)^2)) of a (rows, 128) slab as f32."""
    rows, lane = x2d.shape
    assert lane == LANE
    itemsize = jnp.dtype(x2d.dtype).itemsize
    # Sublane quantum of the packed min tile: 8 rows f32, 16 bf16, 32 int8/fp8.
    sublane_quantum = 8 * max(1, 4 // itemsize)
    rows_rounded = _round_up(rows, sublane_quantum)
    if rows_rounded <= _CHUNK_ROWS:
        block_rows = rows_rounded
        chunk_rows = rows_rounded
    else:
        block_rows = min(_MAX_BLOCK_ROWS, _round_up(rows_rounded, _CHUNK_ROWS))
        chunk_rows = _CHUNK_ROWS
    chunks_per_block = block_rows // chunk_rows

    num_blocks = pl.cdiv(rows, block_rows)
    num_shards = min(_default_num_shards(), num_blocks)
    if num_shards > 1 and num_blocks % num_shards != 0 and num_blocks < 8:
        # A clamped duplicate (fully masked) block would be a large fraction of
        # the work for small inputs; a single shard avoids it entirely.
        num_shards = 1
    blocks_per_shard = pl.cdiv(num_blocks, num_shards)
    num_full_blocks = rows // block_rows
    needs_mask = (num_shards * blocks_per_shard) > num_full_blocks

    def x_index(s, j):
        # Clamp so an overshoot block re-reads the last real block instead of
        # going out of bounds; the kernel masks its contribution to zero.
        return (jnp.minimum(s * blocks_per_shard + j, num_blocks - 1), 0)

    kern = functools.partial(
        _reduce_kernel,
        chunk_rows=chunk_rows,
        chunks_per_block=chunks_per_block,
        block_rows=block_rows,
        rows_valid=rows,
        blocks_per_shard=blocks_per_shard,
        num_full_blocks=num_full_blocks,
        needs_mask=needs_mask)

    out_cols = num_shards * LANE
    shift_arr = jnp.reshape(center.astype(jnp.float32), (1,))
    sum_part, sq_part = pl.pallas_call(
        kern,
        out_shape=(jax.ShapeDtypeStruct((1, out_cols), jnp.float32),
                   jax.ShapeDtypeStruct((1, out_cols), jnp.float32)),
        grid=(num_shards, blocks_per_shard),
        in_specs=[pl.BlockSpec(memory_space=pltpu.MemorySpace.SMEM),
                  pl.BlockSpec((block_rows, LANE), x_index)],
        out_specs=(pl.BlockSpec((1, LANE), lambda s, j: (0, s)),
                   pl.BlockSpec((1, LANE), lambda s, j: (0, s))),
        scratch_shapes=[pltpu.VMEM((8, LANE), jnp.float32),
                        pltpu.VMEM((8, LANE), jnp.float32)],
        compiler_params=pltpu.CompilerParams(
            dimension_semantics=("parallel", "arbitrary")),
        cost_estimate=pl.CostEstimate(
            flops=4 * rows * LANE,
            transcendentals=0,
            bytes_accessed=rows * LANE * itemsize + 2 * out_cols * 4),
    )(shift_arr, x2d)
    return jnp.sum(sum_part), jnp.sum(sq_part)


def _var_mean(loss):
    """Biased (unbiased=False) variance and mean over all elements."""
    flat = loss.reshape(-1)
    n = flat.shape[0]
    rows = n // LANE
    tail_len = n - rows * LANE

    # Shifted accumulation: subtract a representative value before squaring so
    # E[x^2]-E[x]^2 stays well conditioned when |mean| >> std.
    center = flat[0].astype(jnp.float32)

    if rows > 0:
        bulk = flat if tail_len == 0 else flat[: rows * LANE]
        total_s, total_q = _partial_sums_pallas(bulk.reshape(rows, LANE), center)
    else:
        total_s = jnp.float32(0.0)
        total_q = jnp.float32(0.0)

    if tail_len:  # < 128 leftover elements: fold in with plain JAX.
        tail = flat[rows * LANE:].astype(jnp.float32) - center
        total_s = total_s + jnp.sum(tail)
        total_q = total_q + jnp.sum(tail * tail)

    n_f = jnp.float32(n)
    d_mean = total_s / n_f                  # mean of (x - center)
    mean = center + d_mean
    # TODO(synk): Kahan / pairwise accumulation across blocks for N >~ 1e8 if
    # tighter tolerances are ever needed; the shift already removes the main
    # cancellation hazard.
    var = jnp.maximum(total_q / n_f - d_mean * d_mean, 0.0)
    return var, mean


def mean_variance(loss, c=0.1, reduction="mean"):
    """JAX/Pallas equivalent of MeanVariance.forward(loss)."""
    orig_dtype = loss.dtype
    n = loss.size
    var, mean = _var_mean(loss)
    penalty = var * jnp.float32(c)

    if reduction == "mean":
        return (mean + penalty).astype(orig_dtype)
    elif reduction == "sum":
        # sum(loss + c*var) == n*mean + n*c*var == n*(mean + c*var)
        return ((mean + penalty) * jnp.float32(n)).astype(orig_dtype)
    elif reduction == "none":
        # Scalar broadcast-add is trivially memory-bound; XLA hits roofline on
        # it directly, with no pad/reshape/slice plumbing.
        return loss + penalty.astype(orig_dtype)
    else:
        raise Exception("Only mean, sum, none reduction types supported.")


if __name__ == "__main__":
    key = jax.random.PRNGKey(0)
    c = 0.1

    def ref_outputs(x):
        m = jnp.mean(x)
        v = jnp.mean((x - m) ** 2)   # biased variance (unbiased=False)
        return m + c * v, jnp.sum(x + c * v), x + c * v

    # Small NCHW-like per-element loss map.
    loss = jax.random.normal(key, (2, 4, 16, 16), dtype=jnp.float32)
    ref_mean, ref_sum, ref_none = ref_outputs(loss)
    out_mean = mean_variance(loss, c=c, reduction="mean")
    out_sum = mean_variance(loss, c=c, reduction="sum")
    out_none = mean_variance(loss, c=c, reduction="none")
    jax.block_until_ready((out_mean, out_sum, out_none))
    assert jnp.allclose(out_mean, ref_mean, atol=1e-5), (out_mean, ref_mean)
    assert jnp.allclose(out_sum, ref_sum, atol=1e-3, rtol=1e-5), (out_sum, ref_sum)
    assert out_none.shape == loss.shape
    assert jnp.allclose(out_none, ref_none, atol=1e-5)

    # Ragged size (numel % 128 != 0): exercises the gated in-kernel row mask
    # plus the plain-JAX tail.
    loss2 = jax.random.normal(jax.random.PRNGKey(1), (5, 97), dtype=jnp.float32)
    r_mean, _, r_none = ref_outputs(loss2)
    o_mean = mean_variance(loss2, c=c, reduction="mean")
    o_none = mean_variance(loss2, c=c, reduction="none")
    jax.block_until_ready((o_mean, o_none))
    assert jnp.allclose(o_mean, r_mean, atol=1e-5), (o_mean, r_mean)
    assert jnp.allclose(o_none, r_none, atol=1e-5)

    # Larger map: multiple row blocks, ragged last block (gated edge mask) and
    # the shard axis when the device has more than one TensorCore.
    loss3 = jax.random.normal(jax.random.PRNGKey(2), (17, 8, 64, 64),
                              dtype=jnp.float32)
    l_mean, _, _ = ref_outputs(loss3)
    o3_mean = mean_variance(loss3, c=c, reduction="mean")
    jax.block_until_ready(o3_mean)
    assert jnp.allclose(o3_mean, l_mean, atol=1e-5, rtol=1e-4), (o3_mean, l_mean)

    print("KERNEL_OK")
</pallas_src>

<mosaic_0001>
module attributes {stable_mosaic.version = 11 : i64} {
  func.func @_reduce_kernel(%arg0: i32, %arg1: i32, %arg2: memref<1xf32, #tpu.memory_space<smem>>, %arg3: memref<16x128xf32, #tpu.memory_space<vmem>>, %arg4: memref<1x128xf32, #tpu.memory_space<vmem>>, %arg5: memref<1x128xf32, #tpu.memory_space<vmem>>, %arg6: memref<8x128xf32, #tpu.memory_space<vmem>>, %arg7: memref<8x128xf32, #tpu.memory_space<vmem>>) attributes {dimension_semantics = [#tpu.dimension_semantics<parallel>, #tpu.dimension_semantics<arbitrary>], iteration_bounds = array<i64: 1, 1>, scalar_prefetch = 0 : i64, scratch_operands = 2 : i64, tpu.core_type = #tpu.core_type<tc>, window_params = [{transform_indices = @transform_0, window_bounds = array<i64: 1>}, {transform_indices = @transform_1, window_bounds = array<i64: 16, 128>}, {transform_indices = @transform_2, window_bounds = array<i64: 1, 128>}, {transform_indices = @transform_3, window_bounds = array<i64: 1, 128>}]} {
    %c0_i32 = arith.constant 0 : i32
    %0 = arith.cmpi eq, %arg1, %c0_i32 : i32
    %1 = arith.extui %0 : i1 to i32
    %c0_i32_0 = arith.constant 0 : i32
    %2 = arith.cmpi ne, %1, %c0_i32_0 : i32
    scf.if %2 {
      %cst_15 = arith.constant 0.000000e+00 : f32
      %26 = vector.broadcast %cst_15 : f32 to vector<8x128xf32>
      %c0_16 = arith.constant 0 : index
      %c0_17 = arith.constant 0 : index
      %27 = vector.load %arg6[%c0_16, %c0_17] : memref<8x128xf32, #tpu.memory_space<vmem>>, vector<8x128xf32>
      tpu.vector_store %arg6[%c0_16, %c0_17], %26 {strides = array<i32>} : memref<8x128xf32, #tpu.memory_space<vmem>>, vector<8x128xf32>,
      %cst_18 = arith.constant 0.000000e+00 : f32
      %28 = vector.broadcast %cst_18 : f32 to vector<8x128xf32>
      %c0_19 = arith.constant 0 : index
      %c0_20 = arith.constant 0 : index
      %29 = vector.load %arg7[%c0_19, %c0_20] : memref<8x128xf32, #tpu.memory_space<vmem>>, vector<8x128xf32>
      tpu.vector_store %arg7[%c0_19, %c0_20], %28 {strides = array<i32>} : memref<8x128xf32, #tpu.memory_space<vmem>>, vector<8x128xf32>,
    } else {
    }
    %c0 = arith.constant 0 : index
    %3 = memref.load %arg2[%c0] : memref<1xf32, #tpu.memory_space<smem>>
    %cst = arith.constant 0.000000e+00 : f32
    %4 = vector.broadcast %cst : f32 to vector<8x128xf32>
    %c0_i32_1 = arith.constant 0 : i32
    %c16_i32 = arith.constant 16 : i32
    %5 = arith.muli %c0_i32_1, %c16_i32 : i32
    %6 = tpu.assume_multiple %5, 16 : i32
    %7 = arith.index_cast %6 : i32 to index
    %c0_2 = arith.constant 0 : index
    %8 = vector.load %arg3[%7, %c0_2] : memref<16x128xf32, #tpu.memory_space<vmem>>, vector<16x128xf32>
    %9 = vector.broadcast %3 : f32 to vector<16x128xf32>
    %10 = arith.subf %8, %9 : vector<16x128xf32>
    %11 = vector.shape_cast %10 : vector<16x128xf32> to vector<2x8x128xf32>
    %cst_3 = arith.constant dense<0.000000e+00> : vector<8x128xf32>
    %12 = vector.multi_reduction <add>, %11, %cst_3 [0] : vector<2x8x128xf32> to vector<8x128xf32>
    %13 = arith.mulf %11, %11 : vector<2x8x128xf32>
    %cst_4 = arith.constant dense<0.000000e+00> : vector<8x128xf32>
    %14 = vector.multi_reduction <add>, %13, %cst_4 [0] : vector<2x8x128xf32> to vector<8x128xf32>
    %15 = arith.addf %4, %12 : vector<8x128xf32>
    %16 = arith.addf %4, %14 : vector<8x128xf32>
    %c1_i32 = arith.constant 1 : i32
    %c0_5 = arith.constant 0 : index
    %c0_6 = arith.constant 0 : index
    %17 = vector.load %arg6[%c0_5, %c0_6] : memref<8x128xf32, #tpu.memory_space<vmem>>, vector<8x128xf32>
    %18 = arith.addf %17, %15 : vector<8x128xf32>
    %c0_7 = arith.constant 0 : index
    %c0_8 = arith.constant 0 : index
    %19 = vector.load %arg6[%c0_7, %c0_8] : memref<8x128xf32, #tpu.memory_space<vmem>>, vector<8x128xf32>
    tpu.vector_store %arg6[%c0_7, %c0_8], %18 {strides = array<i32>} : memref<8x128xf32, #tpu.memory_space<vmem>>, vector<8x128xf32>,
    %c0_9 = arith.constant 0 : index
    %c0_10 = arith.constant 0 : index
    %20 = vector.load %arg7[%c0_9, %c0_10] : memref<8x128xf32, #tpu.memory_space<vmem>>, vector<8x128xf32>
    %21 = arith.addf %20, %16 : vector<8x128xf32>
    %c0_11 = arith.constant 0 : index
    %c0_12 = arith.constant 0 : index
    %22 = vector.load %arg7[%c0_11, %c0_12] : memref<8x128xf32, #tpu.memory_space<vmem>>, vector<8x128xf32>
    tpu.vector_store %arg7[%c0_11, %c0_12], %21 {strides = array<i32>} : memref<8x128xf32, #tpu.memory_space<vmem>>, vector<8x128xf32>,
    %c0_i32_13 = arith.constant 0 : i32
    %23 = arith.cmpi eq, %arg1, %c0_i32_13 : i32
    %24 = arith.extui %23 : i1 to i32
    %c0_i32_14 = arith.constant 0 : i32
    %25 = arith.cmpi ne, %24, %c0_i32_14 : i32
    scf.if %25 {
      %c0_15 = arith.constant 0 : index
      %c0_16 = arith.constant 0 : index
      %26 = vector.load %arg6[%c0_15, %c0_16] : memref<8x128xf32, #tpu.memory_space<vmem>>, vector<8x128xf32>
      %cst_17 = arith.constant dense<0.000000e+00> : vector<128xf32>
      %27 = vector.multi_reduction <add>, %26, %cst_17 [0] : vector<8x128xf32> to vector<128xf32>
      %28 = vector.shape_cast %27 : vector<128xf32> to vector<1x128xf32>
      %c0_18 = arith.constant 0 : index
      %c0_19 = arith.constant 0 : index
      %29 = vector.load %arg4[%c0_18, %c0_19] : memref<1x128xf32, #tpu.memory_space<vmem>>, vector<1x128xf32>
      tpu.vector_store %arg4[%c0_18, %c0_19], %28 {strides = array<i32>} : memref<1x128xf32, #tpu.memory_space<vmem>>, vector<1x128xf32>,
      %c0_20 = arith.constant 0 : index
      %c0_21 = arith.constant 0 : index
      %30 = vector.load %arg7[%c0_20, %c0_21] : memref<8x128xf32, #tpu.memory_space<vmem>>, vector<8x128xf32>
      %cst_22 = arith.constant dense<0.000000e+00> : vector<128xf32>
      %31 = vector.multi_reduction <add>, %30, %cst_22 [0] : vector<8x128xf32> to vector<128xf32>
      %32 = vector.shape_cast %31 : vector<128xf32> to vector<1x128xf32>
      %c0_23 = arith.constant 0 : index
      %c0_24 = arith.constant 0 : index
      %33 = vector.load %arg5[%c0_23, %c0_24] : memref<1x128xf32, #tpu.memory_space<vmem>>, vector<1x128xf32>
      tpu.vector_store %arg5[%c0_23, %c0_24], %32 {strides = array<i32>} : memref<1x128xf32, #tpu.memory_space<vmem>>, vector<1x128xf32>,
    } else {
    }
    return
  }
  func.func @transform_0(%arg0: i32, %arg1: i32) -> i32 {
    %c0_i32 = arith.constant 0 : i32
    %c0_i32_0 = arith.constant 0 : i32
    return %c0_i32 : i32
  }
  func.func @transform_1(%arg0: i32, %arg1: i32) -> (i32, i32) {
    %c1_i32 = arith.constant 1 : i32
    %0 = arith.muli %arg0, %c1_i32 : i32
    %1 = arith.addi %0, %arg1 : i32
    %c0_i32 = arith.constant 0 : i32
    %2 = arith.minsi %1, %c0_i32 : i32
    %c0_i32_0 = arith.constant 0 : i32
    %c0_i32_1 = arith.constant 0 : i32
    return %2, %c0_i32_0 : i32, i32
  }
  func.func @transform_2(%arg0: i32, %arg1: i32) -> (i32, i32) {
    %c0_i32 = arith.constant 0 : i32
    %c0_i32_0 = arith.constant 0 : i32
    return %c0_i32, %arg0 : i32, i32
  }
  func.func @transform_3(%arg0: i32, %arg1: i32) -> (i32, i32) {
    %c0_i32 = arith.constant 0 : i32
    %c0_i32_0 = arith.constant 0 : i32
    return %c0_i32, %arg0 : i32, i32
  }
}

</mosaic_0001>

<bundles_post_ra>
// kernel: tpu_custom_call.1
= control target key start
LH: loop header
LB: loop body
LE: loop exit
PB: predicated region body
PF: predicated region fallthrough
CT: control target
= control target key end

     0   :  { %10 = vsyncpa [#allocation6], 0  ;;  %s222_s0 = inlined_call_operand.<no memory space> [shape: f32[1], index: 0, kind: input, shape index: {}]   ;;  %s223_s1 = inlined_call_operand.hbm [shape: f32[16,128], index: 1, kind: input, shape index: {}]   ;;  %s224_s2 = inlined_call_operand.hbm [shape: f32[1,128], index: 2, kind: output, shape index: {0}]   ;;  %s225_s3 = inlined_call_operand.hbm [shape: f32[1,128], index: 3, kind: output, shape index: {1}]  }
   0x1   :  { %11 = vsyncpa [#allocation7], 0 }
   0x2   :  { %12 = vsyncpa [#allocation10], 0  ;;  %s185_s12 = smov [#allocation5]  }
   0x3   :  { %s26_s13 = sshll.u32 %s185_s12, 4  ;;  %s27_s13 = int_to_ptr.vmem [resolvable:$true] %s26_s13 }
   0x4   :  { %s127_s14 = scalar_lea.vmem %s27_s13, 256  ;;  %p132_p1 = scmp.lt.s32.totalorder %s27_s13, %s27_s13 }
   0x5   :  { %p128_p0 = scmp.ne.s32.totalorder %s27_s13, %s127_s14  ;;  %p133_p2 = scmp.lt.s32.totalorder %s127_s14, %s127_s14 }
   0x7   :  { %p134_p3 = por %p133_p2, %p132_p1 }
   0x9   :  { %p135_p4 = pnand %p134_p3, %p128_p0 }
   0xb   :  { %138 = shalt.err (!%p135_p4)
}
   0xc   :  { %s186_s15 = smov 128   ;;  %s187_s16 = smov 8  }
   0xd   :  { %32 = dma.hbm_to_vmem [thread:$0]  %s223_s1, 256, %s27_s13, [#allocation6], %s186_s15, %s186_s15, %s187_s16  }
   0xe   :  { %179 = dma.done.wait [#allocation6], 256  }
   0xf   :  { %180 = vsyncadd [#allocation6], 4294967040  ;;  %v49_v0 = vstv %s222_s0  ;;  %v47_v1 = vld [vmem:[#allocation5] sm:$0xff]  ;;  %v48_v2 = vld [vmem:[#allocation5 + $0x8] sm:$0xff]  ;;  %s188_s1 = smov [#allocation8]   ;;  %s189_s0 = smov [#allocation9]  }
  0x10   :  { %v50_v3 = vsub.f32 %v47_v1, %v49_v0  ;;  %v51_v4 = vsub.f32 %v48_v2, %v49_v0  ;;  %s89_s21 = sshll.u32 %s188_s1, 4  ;;  %s99_s22 = sshll.u32 %s189_s0, 4  ;;  %s90_s21 = int_to_ptr.vmem [resolvable:$true] %s89_s21  ;;  %s100_s22 = int_to_ptr.vmem [resolvable:$true] %s99_s22 }
  0x11   :  { %s139_s23 = scalar_lea.vmem %s90_s21, 16  ;;  %s143_s24 = scalar_lea.vmem %s90_s21, 32 }
  0x12   :  { %v52_v5 = vadd.f32 %v51_v4, %v50_v3  ;;  %v53_v6 = vmul.f32 %v50_v3, %v50_v3  ;;  %v54_v7 = vmul.f32 %v51_v4, %v51_v4  ;;  %p140_p5 = scmp.ne.s32.totalorder %s90_s21, %s139_s23  ;;  %p144_p6 = scmp.lt.s32.totalorder %s90_s21, %s90_s21 }
  0x13   :  { %p145_p7 = scmp.lt.s32.totalorder %s143_s24, %s139_s23 }
  0x14   :  { %v68_v8 = vrot.slane %v52_v5, 4  ;;  %v55_v9 = vadd.f32 %v54_v7, %v53_v6 }
  0x15   :  { %p146_p8 = por %p145_p7, %p144_p6 }
  0x16   :  { %v69_v10 = vadd.f32 %v68_v8, %v52_v5  ;;  %v76_v11 = vrot.slane %v55_v9, 4 }
  0x17   :  { %p147_p9 = pnand %p146_p8, %p140_p5 }
  0x18   :  { %v70_v12 = vrot.slane %v69_v10, 2  ;;  %v77_v13 = vadd.f32 %v76_v11, %v55_v9 }
  0x1a   :  { %v71_v14 = vadd.f32 %v70_v12, %v69_v10  ;;  %v78_v15 = vrot.slane %v77_v13, 2 }
  0x1c   :  { %v72_v16 = vrot.slane %v71_v14, 1  ;;  %v79_v17 = vadd.f32 %v78_v15, %v77_v13 }
  0x1e   :  { %v73_v18 = vadd.f32 %v72_v16, %v71_v14  ;;  %v80_v19 = vrot.slane %v79_v17, 1 }
  0x20   :  { %74 = vst [vmem:[#allocation8] sm:$0x1] %v73_v18  ;;  %v81_v20 = vadd.f32 %v80_v19, %v79_v17 }
  0x21   :  { %150 = shalt.err (!%p147_p9)
}
  0x22   :  { %92 = dma.vmem_to_hbm [thread:$0]  %s90_s21, 16, %s224_s2, [#allocation7]   ;;  %82 = vst [vmem:[#allocation9] sm:$0x1] %v81_v20 }
  0x23   :  { %s159_s27 = scalar_lea.vmem %s100_s22, 16  ;;  %s163_s28 = scalar_lea.vmem %s100_s22, 32 }
  0x24   :  { %p160_p10 = scmp.ne.s32.totalorder %s100_s22, %s159_s27  ;;  %p164_p11 = scmp.lt.s32.totalorder %s100_s22, %s100_s22 }
  0x25   :  { %p165_p12 = scmp.lt.s32.totalorder %s163_s28, %s159_s27 }
  0x27   :  { %p166_p13 = por %p165_p12, %p164_p11 }
  0x29   :  { %p167_p0 = pnand %p166_p13, %p160_p10 }
  0x2b   :  { %170 = shalt.err (!%p167_p0)
}
  0x2c   :  { %102 = dma.vmem_to_hbm [thread:$0]  %s100_s22, 16, %s225_s3, [#allocation10]  }
  0x2d   :  { %181 = dma.done.wait [#allocation7], 16  }
  0x2e   :  { %182 = vsyncadd [#allocation7], 4294967280 }
  0x2f   :  { %183 = dma.done.wait [#allocation10], 16  }
  0x30   :  { %184 = vsyncadd [#allocation10], 4294967280 }
  0x31   :  { %109 = vsyncpa [#allocation6], 1 }
  0x32   :  { %110 = vsyncpa [#allocation7], 1 }
  0x33   :  { %111 = vsyncpa [#allocation10], 1 }

</bundles_post_ra>
